<compile_context>
chip_gen: v6e
topology: v6e:2x2x1
jax: 0.10.0
libtpu: 0.0.40
codegen_flags: <defaults>
</compile_context>

<pallas_src>
import functools

import jax
import jax.numpy as jnp
from jax.experimental import pallas as pl
from jax.experimental.pallas import tpu as pltpu

HIDDEN = 32                      # config.hidden_size
_LANE = 128
_MAX_TILE = 16384                # rows (lanes) per grid step
_VMEM_LIMIT = 40 * 1024 * 1024   # fits comfortably on v5e/v6e/v7x


def _default_tile(n):
    return min(_MAX_TILE, _LANE * ((n + _LANE - 1) // _LANE))


# --------------------------------------------------------------- kernels ----

def _q_rows(x_ref, wp_ref):
    """Per-row MLP output in feature-major layout.  Returns (1, tile).

    wp_ref is (H, 5) with columns [w1_for_x0, w1_for_x1, b1, W2@W3, beta],
    where beta is the folded output bias (pre-centered for the train path).
    """
    x0 = x_ref[0:1, :]                                          # (1, tile)
    x1 = x_ref[1:2, :]                                          # (1, tile)
    h1 = jnp.maximum(
        wp_ref[:, 0:1] * x0 + wp_ref[:, 1:2] * x1 + wp_ref[:, 2:3], 0.0
    )                                                           # (H, tile)
    q = jnp.sum(h1 * wp_ref[:, 3:4], axis=0, keepdims=True)     # (1, tile)
    return q + wp_ref[0:1, 4:5]                                 # + beta


def _train_kernel(x_ref, wp_ref, so_ref, soo_ref, st_ref, stt_ref,
                  acc_o, acc_oo, acc_t, acc_tt, *, n_rows):
    c = pl.program_id(0)            # core-split axis ("parallel")
    s = pl.program_id(1)            # row-block axis ("arbitrary", carries acc)
    n_s = pl.num_programs(1)
    tile = x_ref.shape[1]

    @pl.when(s == 0)
    def _():
        acc_o[...] = jnp.zeros_like(acc_o)
        acc_oo[...] = jnp.zeros_like(acc_oo)
        acc_t[...] = jnp.zeros_like(acc_t)
        acc_tt[...] = jnp.zeros_like(acc_tt)

    o = _q_rows(x_ref, wp_ref)      # (1, tile)  centered model output
    t = x_ref[2:3, :]               # (1, tile)  centered target (wrapper-prepped)

    # Mask lanes past the true N (padded tail / fully padded blocks).
    col0 = (c * n_s + s) * tile
    col = jax.lax.broadcasted_iota(jnp.int32, (1, tile), 1) + col0
    valid = col < n_rows
    o_m = jnp.where(valid, o, 0.0)
    t_m = jnp.where(valid, t, 0.0)

    # Vreg-wide partial sums: purely elementwise per step (no cross-lane work).
    acc_o[...] += o_m
    acc_oo[...] += o_m * o_m
    acc_t[...] += t_m
    acc_tt[...] += t_m * t_m

    @pl.when(s == n_s - 1)
    def _():
        so_ref[...] = jnp.sum(acc_o[...], axis=1, keepdims=True).reshape(1, 1, 1)
        soo_ref[...] = jnp.sum(acc_oo[...], axis=1, keepdims=True).reshape(1, 1, 1)
        st_ref[...] = jnp.sum(acc_t[...], axis=1, keepdims=True).reshape(1, 1, 1)
        stt_ref[...] = jnp.sum(acc_tt[...], axis=1, keepdims=True).reshape(1, 1, 1)


def _eval_kernel(x_ref, wp_ref, out_ref):
    out_ref[...] = _q_rows(x_ref, wp_ref)      # lane-dense (1, tile) store


# --------------------------------------------------------------- wrapper ----

def _pack_weights(params, beta):
    """Fold Linear(H,H)->Linear(H,1) and pack everything into one (H,5) block."""
    hidden = params["w1"].shape[1]
    w1 = params["w1"].astype(jnp.float32)                    # (2, H)
    b1 = params["b1"].astype(jnp.float32)                    # (1, H)
    w23 = params["w2"].astype(jnp.float32) @ params["w3"].astype(jnp.float32)  # (H,1)
    beta_col = jnp.full((hidden, 1), beta, dtype=jnp.float32)
    return jnp.concatenate([w1.T, b1.T, w23, beta_col], axis=1)   # (H, 5)


@functools.partial(jax.jit, static_argnames=("train", "tile"))
def my_network_forward(x, params, train=True, tile=None):
    """x: (N, >=3) float32. Returns scalar loss if train else (N, 1) output."""
    n = x.shape[0]
    hidden = params["w1"].shape[1]
    tile = _default_tile(n) if tile is None else tile
    assert tile % _LANE == 0

    b23 = (params["b2"].astype(jnp.float32) @ params["w3"].astype(jnp.float32)
           + params["b3"].astype(jnp.float32))[0, 0]

    if train:
        n_blocks = -(-n // tile)
        nc = 2 if n_blocks >= 2 else 1          # split reduction over 2 TCs (v7x)
        s_per_core = -(-n_blocks // nc)
        n_pad = nc * s_per_core * tile

        # Center by the first target value (shift-invariant loss; kills the
        # cancellation in the closed form).  Transpose + subtract + pad fuse
        # into one XLA pass under jit.
        # NOTE: accepting x already feature-major (3, N) upstream would remove
        # this wrapper HBM pass entirely.
        center = x[0, 2].astype(jnp.float32)
        xt = jnp.concatenate(
            [x[:, :2].astype(jnp.float32).T,
             (x[:, 2].astype(jnp.float32) - center)[None, :]], axis=0)   # (3, n)
        xt = jnp.pad(xt, ((0, 0), (0, n_pad - n)))
        wp = _pack_weights(params, b23 - center)

        sums = pl.pallas_call(
            functools.partial(_train_kernel, n_rows=n),
            out_shape=tuple(jax.ShapeDtypeStruct((nc, 1, 1), jnp.float32)
                            for _ in range(4)),
            grid_spec=pltpu.PrefetchScalarGridSpec(
                num_scalar_prefetch=0,
                grid=(nc, s_per_core),
                in_specs=[
                    pl.BlockSpec((3, tile),
                                 lambda c, s: (0, c * s_per_core + s)),
                    pl.BlockSpec((hidden, 5), lambda c, s: (0, 0)),
                ],
                out_specs=tuple(
                    pl.BlockSpec((1, 1, 1), lambda c, s: (c, 0, 0))
                    for _ in range(4)),
                scratch_shapes=[pltpu.VMEM((1, tile), jnp.float32)] * 4,
            ),
            compiler_params=pltpu.CompilerParams(
                dimension_semantics=("parallel", "arbitrary"),
                vmem_limit_bytes=_VMEM_LIMIT,
            ),
        )(xt, wp)

        s_o, s_oo, s_t, s_tt = (jnp.sum(a) for a in sums)
        nf = jnp.float32(n)
        # mean over the (N,N) broadcast difference, in centered closed form.
        return (nf * (s_oo + s_tt) - 2.0 * s_o * s_t) / (nf * nf)

    # ---- eval: lane-dense (1, N_pad) output slab -------------------------
    n_blocks = -(-n // tile)
    n_pad = n_blocks * tile
    x2t = jnp.pad(x[:, :2].astype(jnp.float32).T, ((0, 0), (0, n_pad - n)))
    wp = _pack_weights(params, b23)

    out = pl.pallas_call(
        _eval_kernel,
        out_shape=jax.ShapeDtypeStruct((1, n_pad), jnp.float32),
        grid_spec=pltpu.PrefetchScalarGridSpec(
            num_scalar_prefetch=0,
            grid=(n_blocks,),
            in_specs=[
                pl.BlockSpec((2, tile), lambda i: (0, i)),
                pl.BlockSpec((hidden, 5), lambda i: (0, 0)),
            ],
            out_specs=pl.BlockSpec((1, tile), lambda i: (0, i)),
        ),
        compiler_params=pltpu.CompilerParams(
            dimension_semantics=("parallel",),
            vmem_limit_bytes=_VMEM_LIMIT,
        ),
    )(x2t, wp)
    return out[0, :n].reshape(n, 1)


# ------------------------------------------------------------- utilities ----

def init_params(key, hidden=HIDDEN):
    """Deterministic PyTorch-style init: U(-1/sqrt(fan_in), 1/sqrt(fan_in))."""
    ks = jax.random.split(key, 6)

    def lin(kw, kb, fan_in, fan_out):
        bound = 1.0 / jnp.sqrt(float(fan_in))
        w = jax.random.uniform(kw, (fan_in, fan_out), jnp.float32, -bound, bound)
        b = jax.random.uniform(kb, (1, fan_out), jnp.float32, -bound, bound)
        return w, b

    w1, b1 = lin(ks[0], ks[1], 2, hidden)
    w2, b2 = lin(ks[2], ks[3], hidden, hidden)
    w3, b3 = lin(ks[4], ks[5], hidden, 1)
    return dict(w1=w1, b1=b1, w2=w2, b2=b2, w3=w3, b3=b3)


def _reference_forward(x, params, train=True):
    """Pure-JAX reference mirroring the PyTorch forward (for validation)."""
    h1 = jnp.maximum(x[:, :2] @ params["w1"] + params["b1"], 0.0)
    h2 = h1 @ params["w2"] + params["b2"]
    out = h2 @ params["w3"] + params["b3"]           # (N, 1)
    if not train:
        return out
    diff = out - x[:, 2][None, :]                    # (N,1) vs (N,) -> (N,N)
    return jnp.mean(diff * diff)


if __name__ == "__main__":
    key = jax.random.PRNGKey(0)
    kp, kx = jax.random.split(key)
    params = init_params(kp)

    ok = True
    # (N, forced tile): single block, ragged single block, multi-block w/ core
    # split + fully-masked tail block, multi-block per-core with ragged tail.
    for n, tile in [(8, None), (13, 128), (300, 128), (1000, 256)]:
        kx, kc = jax.random.split(kx)
        x = jax.random.normal(kc, (n, 3), dtype=jnp.float32) + 0.5

        loss = my_network_forward(x, params, train=True, tile=tile)
        out = my_network_forward(x, params, train=False, tile=tile)
        jax.block_until_ready((loss, out))

        ref_loss = _reference_forward(x, params, train=True)
        ref_out = _reference_forward(x, params, train=False)
        ok &= bool(jnp.allclose(loss, ref_loss, atol=1e-5, rtol=1e-4))
        ok &= bool(jnp.allclose(out, ref_out, atol=1e-5, rtol=1e-4))

    assert ok
    print("KERNEL_OK")
</pallas_src>

<mosaic_0001>
module attributes {stable_mosaic.version = 11 : i64} {
  func.func @_train_kernel(%arg0: i32, %arg1: i32, %arg2: memref<3x128xf32, #tpu.memory_space<vmem>>, %arg3: memref<32x5xf32, #tpu.memory_space<vmem>>, %arg4: memref<1x1x1xf32, #tpu.memory_space<vmem>>, %arg5: memref<1x1x1xf32, #tpu.memory_space<vmem>>, %arg6: memref<1x1x1xf32, #tpu.memory_space<vmem>>, %arg7: memref<1x1x1xf32, #tpu.memory_space<vmem>>, %arg8: memref<1x128xf32, #tpu.memory_space<vmem>>, %arg9: memref<1x128xf32, #tpu.memory_space<vmem>>, %arg10: memref<1x128xf32, #tpu.memory_space<vmem>>, %arg11: memref<1x128xf32, #tpu.memory_space<vmem>>) attributes {dimension_semantics = [#tpu.dimension_semantics<parallel>, #tpu.dimension_semantics<arbitrary>], iteration_bounds = array<i64: 1, 1>, scalar_prefetch = 0 : i64, scratch_operands = 4 : i64, tpu.core_type = #tpu.core_type<tc>, window_params = [{transform_indices = @transform_0, window_bounds = array<i64: 3, 128>}, {pipeline_mode = #tpu.pipeline_mode<synchronous>, transform_indices = @transform_1, window_bounds = array<i64: 32, 5>}, {transform_indices = @transform_2, window_bounds = array<i64: 1, 1, 1>}, {transform_indices = @transform_3, window_bounds = array<i64: 1, 1, 1>}, {transform_indices = @transform_4, window_bounds = array<i64: 1, 1, 1>}, {transform_indices = @transform_5, window_bounds = array<i64: 1, 1, 1>}]} {
    %c0_i32 = arith.constant 0 : i32
    %0 = arith.cmpi eq, %arg1, %c0_i32 : i32
    %1 = arith.extui %0 : i1 to i32
    %c0_i32_0 = arith.constant 0 : i32
    %2 = arith.cmpi ne, %1, %c0_i32_0 : i32
    scf.if %2 {
      %cst_33 = arith.constant 0.000000e+00 : f32
      %57 = vector.broadcast %cst_33 : f32 to vector<1x128xf32>
      %c0_34 = arith.constant 0 : index
      %c0_35 = arith.constant 0 : index
      %58 = vector.load %arg8[%c0_34, %c0_35] : memref<1x128xf32, #tpu.memory_space<vmem>>, vector<1x128xf32>
      tpu.vector_store %arg8[%c0_34, %c0_35], %57 {strides = array<i32>} : memref<1x128xf32, #tpu.memory_space<vmem>>, vector<1x128xf32>,
      %cst_36 = arith.constant 0.000000e+00 : f32
      %59 = vector.broadcast %cst_36 : f32 to vector<1x128xf32>
      %c0_37 = arith.constant 0 : index
      %c0_38 = arith.constant 0 : index
      %60 = vector.load %arg9[%c0_37, %c0_38] : memref<1x128xf32, #tpu.memory_space<vmem>>, vector<1x128xf32>
      tpu.vector_store %arg9[%c0_37, %c0_38], %59 {strides = array<i32>} : memref<1x128xf32, #tpu.memory_space<vmem>>, vector<1x128xf32>,
      %cst_39 = arith.constant 0.000000e+00 : f32
      %61 = vector.broadcast %cst_39 : f32 to vector<1x128xf32>
      %c0_40 = arith.constant 0 : index
      %c0_41 = arith.constant 0 : index
      %62 = vector.load %arg10[%c0_40, %c0_41] : memref<1x128xf32, #tpu.memory_space<vmem>>, vector<1x128xf32>
      tpu.vector_store %arg10[%c0_40, %c0_41], %61 {strides = array<i32>} : memref<1x128xf32, #tpu.memory_space<vmem>>, vector<1x128xf32>,
      %cst_42 = arith.constant 0.000000e+00 : f32
      %63 = vector.broadcast %cst_42 : f32 to vector<1x128xf32>
      %c0_43 = arith.constant 0 : index
      %c0_44 = arith.constant 0 : index
      %64 = vector.load %arg11[%c0_43, %c0_44] : memref<1x128xf32, #tpu.memory_space<vmem>>, vector<1x128xf32>
      tpu.vector_store %arg11[%c0_43, %c0_44], %63 {strides = array<i32>} : memref<1x128xf32, #tpu.memory_space<vmem>>, vector<1x128xf32>,
    } else {
    }
    %c0 = arith.constant 0 : index
    %c0_1 = arith.constant 0 : index
    %3 = vector.load %arg2[%c0, %c0_1] : memref<3x128xf32, #tpu.memory_space<vmem>>, vector<1x128xf32>
    %c1 = arith.constant 1 : index
    %c0_2 = arith.constant 0 : index
    %4 = vector.load %arg2[%c1, %c0_2] : memref<3x128xf32, #tpu.memory_space<vmem>>, vector<1x128xf32>
    %c0_3 = arith.constant 0 : index
    %c0_4 = arith.constant 0 : index
    %5 = vector.load %arg3[%c0_3, %c0_4] : memref<32x5xf32, #tpu.memory_space<vmem>>, vector<32x1xf32>
    %6 = vector.broadcast %5 : vector<32x1xf32> to vector<32x128xf32>
    %7 = vector.broadcast %3 : vector<1x128xf32> to vector<32x128xf32>
    %8 = arith.mulf %6, %7 : vector<32x128xf32>
    %c0_5 = arith.constant 0 : index
    %c1_6 = arith.constant 1 : index
    %9 = vector.load %arg3[%c0_5, %c1_6] : memref<32x5xf32, #tpu.memory_space<vmem>>, vector<32x1xf32>
    %10 = vector.broadcast %9 : vector<32x1xf32> to vector<32x128xf32>
    %11 = vector.broadcast %4 : vector<1x128xf32> to vector<32x128xf32>
    %12 = arith.mulf %10, %11 : vector<32x128xf32>
    %13 = arith.addf %8, %12 : vector<32x128xf32>
    %c0_7 = arith.constant 0 : index
    %c2 = arith.constant 2 : index
    %14 = vector.load %arg3[%c0_7, %c2] : memref<32x5xf32, #tpu.memory_space<vmem>>, vector<32x1xf32>
    %15 = vector.broadcast %14 : vector<32x1xf32> to vector<32x128xf32>
    %16 = arith.addf %13, %15 : vector<32x128xf32>
    %cst = arith.constant 0.000000e+00 : f32
    %17 = vector.broadcast %cst : f32 to vector<32x128xf32>
    %18 = arith.maximumf %16, %17 : vector<32x128xf32>
    %c0_8 = arith.constant 0 : index
    %c3 = arith.constant 3 : index
    %19 = vector.load %arg3[%c0_8, %c3] : memref<32x5xf32, #tpu.memory_space<vmem>>, vector<32x1xf32>
    %20 = vector.broadcast %19 : vector<32x1xf32> to vector<32x128xf32>
    %21 = arith.mulf %18, %20 : vector<32x128xf32>
    %cst_9 = arith.constant dense<0.000000e+00> : vector<128xf32>
    %22 = vector.multi_reduction <add>, %21, %cst_9 [0] : vector<32x128xf32> to vector<128xf32>
    %23 = vector.shape_cast %22 : vector<128xf32> to vector<1x128xf32>
    %c0_10 = arith.constant 0 : index
    %c4 = arith.constant 4 : index
    %24 = vector.load %arg3[%c0_10, %c4] : memref<32x5xf32, #tpu.memory_space<vmem>>, vector<1x1xf32>
    %25 = vector.broadcast %24 : vector<1x1xf32> to vector<1x128xf32>
    %26 = arith.addf %23, %25 : vector<1x128xf32>
    %c2_11 = arith.constant 2 : index
    %c0_12 = arith.constant 0 : index
    %27 = vector.load %arg2[%c2_11, %c0_12] : memref<3x128xf32, #tpu.memory_space<vmem>>, vector<1x128xf32>
    %c1_i32 = arith.constant 1 : i32
    %28 = arith.muli %arg0, %c1_i32 : i32
    %29 = arith.addi %28, %arg1 : i32
    %c128_i32 = arith.constant 128 : i32
    %30 = arith.muli %29, %c128_i32 : i32
    %31 = tpu.iota {dimensions = array<i32: 1>} : vector<1x128xi32>
    %32 = vector.broadcast %30 : i32 to vector<1x128xi32>
    %33 = arith.addi %31, %32 : vector<1x128xi32>
    %c8_i32 = arith.constant 8 : i32
    %34 = vector.broadcast %c8_i32 : i32 to vector<1x128xi32>
    %35 = arith.cmpi slt, %33, %34 : vector<1x128xi32>
    %cst_13 = arith.constant 0.000000e+00 : f32
    %36 = vector.broadcast %cst_13 : f32 to vector<1x128xf32>
    %37 = arith.select %35, %26, %36 : vector<1x128xi1>, vector<1x128xf32>
    %cst_14 = arith.constant 0.000000e+00 : f32
    %38 = vector.broadcast %cst_14 : f32 to vector<1x128xf32>
    %39 = arith.select %35, %27, %38 : vector<1x128xi1>, vector<1x128xf32>
    %c0_15 = arith.constant 0 : index
    %c0_16 = arith.constant 0 : index
    %40 = vector.load %arg8[%c0_15, %c0_16] : memref<1x128xf32, #tpu.memory_space<vmem>>, vector<1x128xf32>
    %41 = arith.addf %40, %37 : vector<1x128xf32>
    %c0_17 = arith.constant 0 : index
    %c0_18 = arith.constant 0 : index
    %42 = vector.load %arg8[%c0_17, %c0_18] : memref<1x128xf32, #tpu.memory_space<vmem>>, vector<1x128xf32>
    tpu.vector_store %arg8[%c0_17, %c0_18], %41 {strides = array<i32>} : memref<1x128xf32, #tpu.memory_space<vmem>>, vector<1x128xf32>,
    %c0_19 = arith.constant 0 : index
    %c0_20 = arith.constant 0 : index
    %43 = vector.load %arg9[%c0_19, %c0_20] : memref<1x128xf32, #tpu.memory_space<vmem>>, vector<1x128xf32>
    %44 = arith.mulf %37, %37 : vector<1x128xf32>
    %45 = arith.addf %43, %44 : vector<1x128xf32>
    %c0_21 = arith.constant 0 : index
    %c0_22 = arith.constant 0 : index
    %46 = vector.load %arg9[%c0_21, %c0_22] : memref<1x128xf32, #tpu.memory_space<vmem>>, vector<1x128xf32>
    tpu.vector_store %arg9[%c0_21, %c0_22], %45 {strides = array<i32>} : memref<1x128xf32, #tpu.memory_space<vmem>>, vector<1x128xf32>,
    %c0_23 = arith.constant 0 : index
    %c0_24 = arith.constant 0 : index
    %47 = vector.load %arg10[%c0_23, %c0_24] : memref<1x128xf32, #tpu.memory_space<vmem>>, vector<1x128xf32>
    %48 = arith.addf %47, %39 : vector<1x128xf32>
    %c0_25 = arith.constant 0 : index
    %c0_26 = arith.constant 0 : index
    %49 = vector.load %arg10[%c0_25, %c0_26] : memref<1x128xf32, #tpu.memory_space<vmem>>, vector<1x128xf32>
    tpu.vector_store %arg10[%c0_25, %c0_26], %48 {strides = array<i32>} : memref<1x128xf32, #tpu.memory_space<vmem>>, vector<1x128xf32>,
    %c0_27 = arith.constant 0 : index
    %c0_28 = arith.constant 0 : index
    %50 = vector.load %arg11[%c0_27, %c0_28] : memref<1x128xf32, #tpu.memory_space<vmem>>, vector<1x128xf32>
    %51 = arith.mulf %39, %39 : vector<1x128xf32>
    %52 = arith.addf %50, %51 : vector<1x128xf32>
    %c0_29 = arith.constant 0 : index
    %c0_30 = arith.constant 0 : index
    %53 = vector.load %arg11[%c0_29, %c0_30] : memref<1x128xf32, #tpu.memory_space<vmem>>, vector<1x128xf32>
    tpu.vector_store %arg11[%c0_29, %c0_30], %52 {strides = array<i32>} : memref<1x128xf32, #tpu.memory_space<vmem>>, vector<1x128xf32>,
    %c0_i32_31 = arith.constant 0 : i32
    %54 = arith.cmpi eq, %arg1, %c0_i32_31 : i32
    %55 = arith.extui %54 : i1 to i32
    %c0_i32_32 = arith.constant 0 : i32
    %56 = arith.cmpi ne, %55, %c0_i32_32 : i32
    scf.if %56 {
      %c0_33 = arith.constant 0 : index
      %c0_34 = arith.constant 0 : index
      %57 = vector.load %arg8[%c0_33, %c0_34] : memref<1x128xf32, #tpu.memory_space<vmem>>, vector<1x128xf32>
      %cst_35 = arith.constant dense<0.000000e+00> : vector<1xf32>
      %58 = vector.multi_reduction <add>, %57, %cst_35 [1] : vector<1x128xf32> to vector<1xf32>
      %59 = vector.shape_cast %58 : vector<1xf32> to vector<1x1xf32>
      %60 = vector.shape_cast %59 : vector<1x1xf32> to vector<1x1x1xf32>
      %c0_36 = arith.constant 0 : index
      %c0_37 = arith.constant 0 : index
      %c0_38 = arith.constant 0 : index
      %61 = vector.load %arg4[%c0_36, %c0_37, %c0_38] : memref<1x1x1xf32, #tpu.memory_space<vmem>>, vector<1x1x1xf32>
      tpu.vector_store %arg4[%c0_36, %c0_37, %c0_38], %60 {strides = array<i32>} : memref<1x1x1xf32, #tpu.memory_space<vmem>>, vector<1x1x1xf32>,
      %c0_39 = arith.constant 0 : index
      %c0_40 = arith.constant 0 : index
      %62 = vector.load %arg9[%c0_39, %c0_40] : memref<1x128xf32, #tpu.memory_space<vmem>>, vector<1x128xf32>
      %cst_41 = arith.constant dense<0.000000e+00> : vector<1xf32>
      %63 = vector.multi_reduction <add>, %62, %cst_41 [1] : vector<1x128xf32> to vector<1xf32>
      %64 = vector.shape_cast %63 : vector<1xf32> to vector<1x1xf32>
      %65 = vector.shape_cast %64 : vector<1x1xf32> to vector<1x1x1xf32>
      %c0_42 = arith.constant 0 : index
      %c0_43 = arith.constant 0 : index
      %c0_44 = arith.constant 0 : index
      %66 = vector.load %arg5[%c0_42, %c0_43, %c0_44] : memref<1x1x1xf32, #tpu.memory_space<vmem>>, vector<1x1x1xf32>
      tpu.vector_store %arg5[%c0_42, %c0_43, %c0_44], %65 {strides = array<i32>} : memref<1x1x1xf32, #tpu.memory_space<vmem>>, vector<1x1x1xf32>,
      %c0_45 = arith.constant 0 : index
      %c0_46 = arith.constant 0 : index
      %67 = vector.load %arg10[%c0_45, %c0_46] : memref<1x128xf32, #tpu.memory_space<vmem>>, vector<1x128xf32>
      %cst_47 = arith.constant dense<0.000000e+00> : vector<1xf32>
      %68 = vector.multi_reduction <add>, %67, %cst_47 [1] : vector<1x128xf32> to vector<1xf32>
      %69 = vector.shape_cast %68 : vector<1xf32> to vector<1x1xf32>
      %70 = vector.shape_cast %69 : vector<1x1xf32> to vector<1x1x1xf32>
      %c0_48 = arith.constant 0 : index
      %c0_49 = arith.constant 0 : index
      %c0_50 = arith.constant 0 : index
      %71 = vector.load %arg6[%c0_48, %c0_49, %c0_50] : memref<1x1x1xf32, #tpu.memory_space<vmem>>, vector<1x1x1xf32>
      tpu.vector_store %arg6[%c0_48, %c0_49, %c0_50], %70 {strides = array<i32>} : memref<1x1x1xf32, #tpu.memory_space<vmem>>, vector<1x1x1xf32>,
      %c0_51 = arith.constant 0 : index
      %c0_52 = arith.constant 0 : index
      %72 = vector.load %arg11[%c0_51, %c0_52] : memref<1x128xf32, #tpu.memory_space<vmem>>, vector<1x128xf32>
      %cst_53 = arith.constant dense<0.000000e+00> : vector<1xf32>
      %73 = vector.multi_reduction <add>, %72, %cst_53 [1] : vector<1x128xf32> to vector<1xf32>
      %74 = vector.shape_cast %73 : vector<1xf32> to vector<1x1xf32>
      %75 = vector.shape_cast %74 : vector<1x1xf32> to vector<1x1x1xf32>
      %c0_54 = arith.constant 0 : index
      %c0_55 = arith.constant 0 : index
      %c0_56 = arith.constant 0 : index
      %76 = vector.load %arg7[%c0_54, %c0_55, %c0_56] : memref<1x1x1xf32, #tpu.memory_space<vmem>>, vector<1x1x1xf32>
      tpu.vector_store %arg7[%c0_54, %c0_55, %c0_56], %75 {strides = array<i32>} : memref<1x1x1xf32, #tpu.memory_space<vmem>>, vector<1x1x1xf32>,
    } else {
    }
    return
  }
  func.func @transform_0(%arg0: i32, %arg1: i32) -> (i32, i32) {
    %c1_i32 = arith.constant 1 : i32
    %0 = arith.muli %arg0, %c1_i32 : i32
    %1 = arith.addi %0, %arg1 : i32
    %c0_i32 = arith.constant 0 : i32
    %c0_i32_0 = arith.constant 0 : i32
    return %c0_i32, %1 : i32, i32
  }
  func.func @transform_1(%arg0: i32, %arg1: i32) -> (i32, i32) {
    %c0_i32 = arith.constant 0 : i32
    %c0_i32_0 = arith.constant 0 : i32
    %c0_i32_1 = arith.constant 0 : i32
    return %c0_i32, %c0_i32_0 : i32, i32
  }
  func.func @transform_2(%arg0: i32, %arg1: i32) -> (i32, i32, i32) {
    %c0_i32 = arith.constant 0 : i32
    %c0_i32_0 = arith.constant 0 : i32
    %c0_i32_1 = arith.constant 0 : i32
    return %arg0, %c0_i32, %c0_i32_0 : i32, i32, i32
  }
  func.func @transform_3(%arg0: i32, %arg1: i32) -> (i32, i32, i32) {
    %c0_i32 = arith.constant 0 : i32
    %c0_i32_0 = arith.constant 0 : i32
    %c0_i32_1 = arith.constant 0 : i32
    return %arg0, %c0_i32, %c0_i32_0 : i32, i32, i32
  }
  func.func @transform_4(%arg0: i32, %arg1: i32) -> (i32, i32, i32) {
    %c0_i32 = arith.constant 0 : i32
    %c0_i32_0 = arith.constant 0 : i32
    %c0_i32_1 = arith.constant 0 : i32
    return %arg0, %c0_i32, %c0_i32_0 : i32, i32, i32
  }
  func.func @transform_5(%arg0: i32, %arg1: i32) -> (i32, i32, i32) {
    %c0_i32 = arith.constant 0 : i32
    %c0_i32_0 = arith.constant 0 : i32
    %c0_i32_1 = arith.constant 0 : i32
    return %arg0, %c0_i32, %c0_i32_0 : i32, i32, i32
  }
}

</mosaic_0001>

<bundles_post_ra>
// kernel: my_network_forward.1
= control target key start
LH: loop header
LB: loop body
LE: loop exit
PB: predicated region body
PF: predicated region fallthrough
CT: control target
= control target key end

     0   :  { %11 = vsyncpa [#allocation7], 0  ;;  %s467_s0 = inlined_call_operand.vmem [shape: f32[3,128], index: 0, kind: input, shape index: {}]   ;;  %s468_s1 = inlined_call_operand.vmem [shape: f32[32,5], index: 1, kind: input, shape index: {}]   ;;  %s469_s2 = inlined_call_operand.hbm [shape: f32[1,1,1], index: 2, kind: output, shape index: {0}]   ;;  %s470_s3 = inlined_call_operand.hbm [shape: f32[1,1,1], index: 3, kind: output, shape index: {1}]   ;;  %s471_s4 = inlined_call_operand.hbm [shape: f32[1,1,1], index: 4, kind: output, shape index: {2}]   ;;  %s472_s5 = inlined_call_operand.hbm [shape: f32[1,1,1], index: 5, kind: output, shape index: {3}]  }
   0x1   :  { %12 = vsyncpa [#allocation9], 0  ;;  %v45_v0 = vld [vmem:[%s468_s1] sm:$0xff]  ;;  %v380_v1 = vmov 1   ;;  %v381_v2 = vmov 0  }
   0x2   :  { %288 = vset.pattern.permute.xlu1 %v380_v1  ;;  %287 = vset.pattern.permute.xlu0 %v381_v2 }
   0x3   :  { %78 = vperm.xlu1 %288, %v45_v0   ;;  %51 = vperm.xlu0 %287, %v45_v0  }
   0x4   :  { %13 = vsyncpa [#allocation12], 0  ;;  %v46_v3 = vld [vmem:[%s468_s1 + $0x8] sm:$0xff]  ;;  %v47_v4 = vld [vmem:[%s468_s1 + $0x10] sm:$0xff]  ;;  %v382_v6 = vmov 2   ;;  %v383_v7 = vmov 3   ;;  %v168_v11 = vlaneseq }
   0x5   :  { %v48_v5 = vld [vmem:[%s468_s1 + $0x18] sm:$0xff]  ;;  %v158_v8 = vld [vmem:[%s468_s1] sm:$0x1]  ;;  %v384_v9 = vmov 4   ;;  %v385_v10 = vmov 0.0   ;;  %vm193_vm1 = vcmask 1040384  }
   0x6   :  { %39 = vst [vmem:[#allocation2] sm:$0x1] %v385_v10  ;;  %40 = vst [vmem:[#allocation3] sm:$0x1] %v385_v10  ;;  %v435_v12 = vand.u32 127, %v168_v11  ;;  %vm197_vm2 = vcmask 0  }
   0x7   :  { %82 = vperm.xlu1 %288, %v46_v3   ;;  %56 = vperm.xlu0 %287, %v46_v3   ;;  %41 = vst [vmem:[#allocation4] sm:$0x1] %v385_v10  ;;  %42 = vst [vmem:[#allocation5] sm:$0x1] %v385_v10  ;;  %v165_v13 = vld [vmem:[%s467_s0 + $0x2] sm:$0x1] }
   0x8   :  { %vm172_vm0 = vcmp.lt.s32.totalorder %v435_v12, 8  ;;  %v276_v28 = vld [vmem:[%s467_s0 + $0x1] ss:$0 sm:$0xff]  ;;  %v275_v29 = vld [vmem:[%s467_s0] ss:$0 sm:$0xff]  ;;  %s386_s0 = smov [#allocation6]  }
   0x9   :  { %v174_v14 = vsel %vm172_vm0, %v165_v13, 0.0  ;;  %s220_s8 = sshll.u32 %s386_s0, 4  ;;  %s387_s9 = smov [#allocation8]   ;;  %s221_s8 = int_to_ptr.vmem [resolvable:$true] %s220_s8 }
   0xa   :  { %v186_v15 = vmul.f32 %v174_v14, %v174_v14  ;;  %s230_s10 = sshll.u32 %s387_s9, 4  ;;  %s388_s11 = smov [#allocation11]   ;;  %s231_s10 = int_to_ptr.vmem [resolvable:$true] %s230_s10 }
   0xb   :  { %86 = vperm.xlu1 %288, %v47_v4   ;;  %61 = vperm.xlu0 %287, %v47_v4   ;;  %s250_s12 = sshll.u32 %s388_s11, 4  ;;  %s389_s13 = smov [#allocation10]   ;;  %s251_s12 = int_to_ptr.vmem [resolvable:$true] %s250_s12 }
   0xc   :  { %s240_s14 = sshll.u32 %s389_s13, 4  ;;  %s294_s15 = scalar_lea.vmem %s221_s8, 16  ;;  %s241_s14 = int_to_ptr.vmem [resolvable:$true] %s240_s14 }
   0xd   :  { %v178_v11 = vld [vmem:[#allocation3] sm:$0x1]  ;;  %p295_p0 = scmp.ne.s32.totalorder %s221_s8, %s294_s15  ;;  %s298_s16 = scalar_lea.vmem %s221_s8, 32 }
   0xe   :  { %v182_v16 = vld [vmem:[#allocation4] sm:$0x1]  ;;  %v185_v17 = vld [vmem:[#allocation5] sm:$0x1]  ;;  %p299_p1 = scmp.lt.s32.totalorder %s221_s8, %s221_s8  ;;  %p300_p2 = scmp.lt.s32.totalorder %s298_s16, %s294_s15 }
   0xf   :  { %90 = vperm.xlu1 %288, %v48_v5   ;;  %66 = vperm.xlu0 %287, %v48_v5   ;;  %v183_v18 = vadd.f32 %v182_v16, %v174_v14  ;;  %v187_v19 = vadd.f32 %v186_v15, %v185_v17 }
  0x10   :  { %p301_p3 = por %p300_p2, %p299_p1 }
  0x11   :  { %184 = vst [vmem:[#allocation4] sm:$0x1] %v183_v18  ;;  %188 = vst [vmem:[#allocation5] sm:$0x1] %v187_v19 }
  0x12   :  { %p302_p4 = pnand %p301_p3, %p295_p0 }
  0x13   :  { %290 = vset.pattern.permute.xlu1 %v382_v6  ;;  %289 = vset.pattern.permute.xlu0 %v382_v6 }
  0x14   :  { %110 = vperm.xlu1 %290, %v46_v3   ;;  %106 = vperm.xlu0 %289, %v45_v0  }
  0x18   :  { %114 = vperm.xlu1 %290, %v47_v4   ;;  %118 = vperm.xlu0 %289, %v48_v5   ;;  %v209_v17 = vld [vmem:[#allocation5] sm:$0x1] }
  0x1c   :  { %291 = vset.pattern.permute.xlu1 %v383_v7  ;;  %292 = vset.pattern.permute.xlu0 %v383_v7 }
  0x1d   :  { %130 = vperm.xlu1 %291, %v45_v0   ;;  %134 = vperm.xlu0 %292, %v46_v3  }
  0x21   :  { %138 = vperm.xlu1 %291, %v47_v4   ;;  %293 = vset.pattern.permute.xlu0 %v384_v9  ;;  %v175_v9 = vld [vmem:[#allocation2] sm:$0x1] }
  0x22   :  { %161 = vperm.xlu0 %293, %v158_v8  }
  0x25   :  { %142 = vperm.xlu1 %291, %v48_v5  }
  0x7e   :  { %v79_v20 = vpop.permute.xlu1 %78  ;;  %v52_v21 = vpop.permute.xlu0 %51 }
  0x7f   :  { %v97_v30 = vmul.f32 %v276_v28, %v79_v20  ;;  %v73_v31 = vmul.f32 %v275_v29, %v52_v21  ;;  %v204_v20 = vld [vmem:[#allocation4] sm:$0x1] }
  0x81   :  { %v101_v39 = vadd.f32 %v97_v30, %v73_v31 }
  0x82   :  { %v83_v22 = vpop.permute.xlu1 %82  ;;  %v57_v23 = vpop.permute.xlu0 %56 }
  0x83   :  { %v98_v32 = vmul.f32 %v276_v28, %v83_v22  ;;  %v74_v33 = vmul.f32 %v275_v29, %v57_v23  ;;  %v210_v22 = vsel %vm193_vm1, %v209_v17, 0.0  ;;  %v205_v23 = vsel %vm193_vm1, %v204_v20, 0.0 }
  0x85   :  { %v102_v38 = vadd.f32 %v98_v32, %v74_v33 }
  0x86   :  { %v87_v24 = vpop.permute.xlu1 %86  ;;  %v62_v25 = vpop.permute.xlu0 %61 }
  0x87   :  { %v99_v36 = vmul.f32 %v276_v28, %v87_v24  ;;  %v75_v37 = vmul.f32 %v275_v29, %v62_v25 }
  0x89   :  { %v103_v42 = vadd.f32 %v99_v36, %v75_v37 }
  0x8a   :  { %v91_v26 = vpop.permute.xlu1 %90  ;;  %v67_v27 = vpop.permute.xlu0 %66 }
  0x8b   :  { %v100_v43 = vmul.f32 %v276_v28, %v91_v26  ;;  %v76_v44 = vmul.f32 %v275_v29, %v67_v27 }
  0x8d   :  { %v104_v52 = vadd.f32 %v100_v43, %v76_v44 }
  0x8f   :  { %v111_v34 = vpop.permute.xlu1 %110  ;;  %v107_v35 = vpop.permute.xlu0 %106 }
  0x90   :  { %v122_v45 = vadd.f32 %v111_v34, %v102_v38  ;;  %v121_v46 = vadd.f32 %v107_v35, %v101_v39 }
  0x92   :  { %v126_v50 = vmax.f32 %v122_v45, 0.0  ;;  %v125_v51 = vmax.f32 %v121_v46, 0.0 }
  0x93   :  { %v115_v40 = vpop.permute.xlu1 %114  ;;  %v119_v41 = vpop.permute.xlu0 %118 }
  0x94   :  { %v123_v47 = vadd.f32 %v115_v40, %v103_v42  ;;  %v124_v54 = vadd.f32 %v119_v41, %v104_v52 }
  0x96   :  { %v127_v53 = vmax.f32 %v123_v47, 0.0  ;;  %v128_v59 = vmax.f32 %v124_v54, 0.0 }
  0x98   :  { %v131_v48 = vpop.permute.xlu1 %130  ;;  %v135_v49 = vpop.permute.xlu0 %134 }
  0x99   :  { %v145_v55 = vmul.f32 %v131_v48, %v125_v51  ;;  %v146_v56 = vmul.f32 %v135_v49, %v126_v50 }
  0x9b   :  { %v149_v60 = vadd.f32 %v146_v56, %v145_v55 }
  0x9c   :  { %v139_v57 = vpop.permute.xlu1 %138 }
  0x9d   :  { %v147_v58 = vmul.f32 %v139_v57, %v127_v53  ;;  %v162_v6 = vpop.permute.xlu0 %161 }
  0x9f   :  { %v150_v62 = vadd.f32 %v149_v60, %v147_v58 }
  0xa0   :  { %v143_v61 = vpop.permute.xlu1 %142 }
  0xa1   :  { %v148_v63 = vmul.f32 %v143_v61, %v128_v59 }
  0xa3   :  { %v151_v0 = vadd.f32 %v150_v62, %v148_v63 }
  0xa5   :  { %v152_v1 = vrot.slane %v151_v0, 4 }
  0xa7   :  { %v153_v2 = vadd.f32 %v152_v1, %v151_v0 }
  0xa9   :  { %v154_v3 = vrot.slane %v153_v2, 2 }
  0xab   :  { %v155_v4 = vadd.f32 %v154_v3, %v153_v2 }
  0xad   :  { %v156_v5 = vrot.slane %v155_v4, 1 }
  0xaf   :  { %v157_v7 = vadd.f32 %v156_v5, %v155_v4 }
  0xb1   :  { %v164_v8 = vadd.f32 %v162_v6, %v157_v7 }
  0xb3   :  { %v173_v10 = vsel %vm172_vm0, %v164_v8, 0.0 }
  0xb4   :  { %v176_v13 = vadd.f32 %v175_v9, %v173_v10  ;;  %v179_v14 = vmul.f32 %v173_v10, %v173_v10 }
  0xb6   :  { %177 = vst [vmem:[#allocation2] sm:$0x1] %v176_v13  ;;  %v180_v15 = vadd.f32 %v179_v14, %v178_v11 }
  0xb8   :  { %181 = vst [vmem:[#allocation3] sm:$0x1] %v180_v15 }
  0xbd   :  { %v192_v16 = vld [vmem:[#allocation2] sm:$0x1] }
  0xbe   :  { %v194_v18 = vsel %vm193_vm1, %v192_v16, 0.0 }
  0xbf   :  { %195 = vadd.xlane.f32.xlu0 %v194_v18  ;;  %v199_v19 = vld [vmem:[#allocation3] sm:$0x1] }
  0xc0   :  { %v200_v21 = vsel %vm193_vm1, %v199_v19, 0.0 }
  0xc1   :  { %201 = vadd.xlane.f32.xlu1 %v200_v21 }
  0xc3   :  { %211 = vadd.xlane.f32.xlu0 %v210_v22 }
  0xc5   :  { %206 = vadd.xlane.f32.xlu1 %v205_v23 }
 0x148   :  { %v196_v12 = vpop.xlane.xlu0 %195 }
 0x149   :  { %198 = vst.msk [vmem:[#allocation6] sm:$0x1] %vm197_vm2, %v196_v12 }
 0x14a   :  { %v202_v24 = vpop.xlane.xlu1 %201 }
 0x14b   :  { %305 = shalt.err (!%p302_p4)
}
 0x14c   :  { %223 = dma.vmem_to_hbm [thread:$0]  %s221_s8, 16, %s469_s2, [#allocation7]   ;;  %203 = vst.msk [vmem:[#allocation8] sm:$0x1] %vm197_vm2, %v202_v24  ;;  %v212_v25 = vpop.xlane.xlu0 %211 }
 0x14d   :  { %s314_s19 = scalar_lea.vmem %s231_s10, 16  ;;  %s318_s20 = scalar_lea.vmem %s231_s10, 32 }
 0x14e   :  { %p315_p5 = scmp.ne.s32.totalorder %s231_s10, %s314_s19  ;;  %p319_p6 = scmp.lt.s32.totalorder %s231_s10, %s231_s10 }
 0x14f   :  { %p320_p7 = scmp.lt.s32.totalorder %s318_s20, %s314_s19 }
 0x151   :  { %p321_p8 = por %p320_p7, %p319_p6 }
 0x153   :  { %p322_p9 = pnand %p321_p8, %p315_p5 }
 0x155   :  { %325 = shalt.err (!%p322_p9)
}
 0x156   :  { %233 = dma.vmem_to_hbm [thread:$0]  %s231_s10, 16, %s470_s3, [#allocation9]   ;;  %213 = vst.msk [vmem:[#allocation11] sm:$0x1] %vm197_vm2, %v212_v25  ;;  %v207_v26 = vpop.xlane.xlu1 %206 }
 0x157   :  { %s334_s2 = scalar_lea.vmem %s251_s12, 16  ;;  %s338_s23 = scalar_lea.vmem %s251_s12, 32 }
 0x158   :  { %p335_p10 = scmp.ne.s32.totalorder %s251_s12, %s334_s2  ;;  %p339_p11 = scmp.lt.s32.totalorder %s251_s12, %s251_s12 }
 0x159   :  { %p340_p12 = scmp.lt.s32.totalorder %s338_s23, %s334_s2 }
 0x15b   :  { %p341_p13 = por %p340_p12, %p339_p11 }
 0x15d   :  { %p342_p0 = pnand %p341_p13, %p335_p10 }
 0x15f   :  { %345 = shalt.err (!%p342_p0)
}
 0x160   :  { %253 = dma.vmem_to_hbm [thread:$0]  %s251_s12, 16, %s472_s5, [#allocation12]   ;;  %208 = vst.msk [vmem:[#allocation10] sm:$0x1] %vm197_vm2, %v207_v26 }
 0x161   :  { %s354_s26 = scalar_lea.vmem %s241_s14, 16  ;;  %s358_s3 = scalar_lea.vmem %s241_s14, 32 }
 0x162   :  { %p355_p1 = scmp.ne.s32.totalorder %s241_s14, %s354_s26  ;;  %p359_p2 = scmp.lt.s32.totalorder %s241_s14, %s241_s14 }
 0x163   :  { %p360_p3 = scmp.lt.s32.totalorder %s358_s3, %s354_s26 }
 0x165   :  { %p361_p4 = por %p360_p3, %p359_p2 }
 0x167   :  { %p362_p5 = pnand %p361_p4, %p355_p1 }
 0x169   :  { %365 = shalt.err (!%p362_p5)
}
 0x16a   :  { %243 = dma.vmem_to_hbm [thread:$0]  %s241_s14, 16, %s471_s4, [#allocation9]  }
 0x16b   :  { %374 = dma.done.wait [#allocation7], 16  }
 0x16c   :  { %375 = vsyncadd [#allocation7], 4294967280 }
 0x16d   :  { %376 = dma.done.wait [#allocation9], 32  }
 0x16e   :  { %377 = vsyncadd [#allocation9], 4294967264 }
 0x16f   :  { %378 = dma.done.wait [#allocation12], 16  }
 0x170   :  { %379 = vsyncadd [#allocation12], 4294967280 }
 0x171   :  { %266 = vsyncpa [#allocation7], 1 }
 0x172   :  { %267 = vsyncpa [#allocation9], 1 }
 0x173   :  { %268 = vsyncpa [#allocation12], 1 }

</bundles_post_ra>
